<compile_context>
chip_gen: v7x
topology: tpu7x:2x2x1
jax: 0.10.0
libtpu: 0.0.40
codegen_flags: <defaults>
</compile_context>

<pallas_src>
import functools

import jax
import jax.numpy as jnp
from jax.experimental import pallas as pl
from jax.experimental.pallas import tpu as pltpu

LANE = 128        # pad feature dims to multiples of 128 (lane-dense)
SUBLANE = 8       # pad batch to multiples of 8 (sublanes)
MXU_M = 128       # fill the MXU M dimension once batch is big enough
NEG_SLOPE = 0.01  # PyTorch LeakyReLU default negative_slope


def _round_up(n, m):
    return ((n + m - 1) // m) * m


# ---------------------------------------------------------------------------
# Path 1: tiny static configs — single gridless fused kernel, layers unrolled.
# ---------------------------------------------------------------------------
def _fused_mlp_kernel(x_ref, w_ref, b_ref, o_ref):
    # x_ref: (Bp, F) f32   w_ref: (L, F, F) bf16   b_ref: (L, 1, F) f32
    h = x_ref[...]                      # f32 activations live in vregs/VMEM
    nb_layers = w_ref.shape[0]
    for l in range(nb_layers):          # static unroll; L is small & static
        y = jnp.dot(h.astype(jnp.bfloat16), w_ref[l],
                    preferred_element_type=jnp.float32) + b_ref[l]
        h = jnp.maximum(y, NEG_SLOPE * y)   # LeakyReLU, one VALU op, f32
    o_ref[...] = h


# ---------------------------------------------------------------------------
# Path 2: layer grid (+ optional batch grid) — per-layer weight DMA pipelined
# under the previous layer's matmul; activations persist in a VMEM scratch.
# ---------------------------------------------------------------------------
def _layered_mlp_kernel(x_ref, w_ref, b_ref, o_ref, h_ref):
    # grid = (batch_tiles, nb_layers); layer axis is innermost ("arbitrary").
    l = pl.program_id(1)

    @pl.when(l == 0)
    def _():
        h_ref[...] = x_ref[...]

    y = jnp.dot(h_ref[...].astype(jnp.bfloat16), w_ref[0],
                preferred_element_type=jnp.float32) + b_ref[0]
    act = jnp.maximum(y, NEG_SLOPE * y)
    h_ref[...] = act

    @pl.when(l == pl.num_programs(1) - 1)
    def _():
        o_ref[...] = act


def fused_mlp(x, w_stack, b_stack, *, out_features):
    """x: (B, Fin); w_stack: (L, F, F) bf16; b_stack: (L, 1, F) f32 -> (B, out)."""
    B, Fin = x.shape
    L, F, _ = w_stack.shape

    # Batch padding: fill the MXU's M dimension once there are enough rows;
    # otherwise just sublane-align (avoid wasted compute for tiny batches).
    if B >= 64:
        tile_b = MXU_M
        Bp = _round_up(B, tile_b)
    else:
        Bp = _round_up(max(B, 1), SUBLANE)
        tile_b = Bp

    # Single pad HLO (zero fill keeps padded lanes exactly zero through the
    # zero weight rows / zero bias, so the valid output is just a slice).
    x_pad = jnp.pad(x.astype(jnp.float32), ((0, Bp - B), (0, F - Fin)))

    weight_bytes = L * F * F * w_stack.dtype.itemsize
    use_grid = (L > 4) or (Bp // tile_b > 1) or (weight_bytes > (8 << 20))

    if not use_grid:
        out = pl.pallas_call(
            _fused_mlp_kernel,
            out_shape=jax.ShapeDtypeStruct((Bp, F), jnp.float32),
            in_specs=[
                pl.BlockSpec((Bp, F), lambda: (0, 0)),
                pl.BlockSpec((L, F, F), lambda: (0, 0, 0)),
                pl.BlockSpec((L, 1, F), lambda: (0, 0, 0)),
            ],
            out_specs=pl.BlockSpec((Bp, F), lambda: (0, 0)),
        )(x_pad, w_stack, b_stack)
    else:
        out = pl.pallas_call(
            _layered_mlp_kernel,
            out_shape=jax.ShapeDtypeStruct((Bp, F), jnp.float32),
            grid_spec=pltpu.PrefetchScalarGridSpec(
                num_scalar_prefetch=0,
                grid=(Bp // tile_b, L),
                in_specs=[
                    pl.BlockSpec((tile_b, F), lambda i, l: (i, 0)),
                    pl.BlockSpec((1, F, F), lambda i, l: (l, 0, 0)),
                    pl.BlockSpec((1, 1, F), lambda i, l: (l, 0, 0)),
                ],
                out_specs=pl.BlockSpec((tile_b, F), lambda i, l: (i, 0)),
                scratch_shapes=[pltpu.VMEM((tile_b, F), jnp.float32)],
            ),
            compiler_params=pltpu.CompilerParams(
                dimension_semantics=("parallel", "arbitrary")),
        )(x_pad, w_stack, b_stack)

    return out[:B, :out_features]


# ---------------------------------------------------------------------------
# Parameter construction matching Model._get_layer_sizes / _init_weights.
# ---------------------------------------------------------------------------
def get_layer_sizes(i, input_size, output_size, nb_layers, max_nb_nodes,
                    node_decay):
    in_sz = int(max_nb_nodes / node_decay ** (i - 1)) if i != 0 else input_size
    out_sz = (int(max_nb_nodes / node_decay ** i)
              if i < nb_layers - 1 else output_size)
    in_sz += 1 if in_sz == 0 else 0
    out_sz += 1 if out_sz == 0 else 0
    return in_sz, out_sz


def init_params(key, input_size, output_size, nb_layers=1, max_nb_nodes=10,
                node_decay=1.5):
    """Linear.weight ~ Normal(0,1); Linear.bias ~ U(-1/sqrt(fan_in), ...).

    Weights are stored transposed (fin, fout) so the kernel does y = x @ W + b.
    """
    if nb_layers == 0:
        sizes = [(input_size, output_size)]
    else:
        sizes = [get_layer_sizes(i, input_size, output_size, nb_layers,
                                 max_nb_nodes, node_decay)
                 for i in range(nb_layers)]
    params = []
    for fin, fout in sizes:
        key, kw, kb = jax.random.split(key, 3)
        w = jax.random.normal(kw, (fin, fout), dtype=jnp.float32)
        bound = 1.0 / (fin ** 0.5)
        b = jax.random.uniform(kb, (fout,), dtype=jnp.float32,
                               minval=-bound, maxval=bound)
        params.append((w, b))
    return params


def pack_params(params):
    """Pack per-layer (w, b) into zero-padded lane-dense stacks.

    Weights go to bf16 (MXU-native, half the DMA); biases stay f32 so the
    elementwise chain (bias add + LeakyReLU) stays in f32 on every chip.
    """
    F = _round_up(max(max(w.shape) for w, _ in params), LANE)
    L = len(params)
    w_stack = jnp.zeros((L, F, F), jnp.float32)
    b_stack = jnp.zeros((L, 1, F), jnp.float32)
    for l, (w, b) in enumerate(params):
        fin, fout = w.shape
        w_stack = w_stack.at[l, :fin, :fout].set(w)
        b_stack = b_stack.at[l, 0, :fout].set(b)
    return w_stack.astype(jnp.bfloat16), b_stack


def mlp_reference(x, params):
    """Pure-JAX f32 reference of the unpadded module math."""
    h = x
    for (w, b) in params:
        y = h @ w + b
        h = jnp.where(y >= 0.0, y, NEG_SLOPE * y)
    return h


def _check(out, ref, tol):
    denom = max(float(jnp.max(jnp.abs(ref))), 1.0)
    err = float(jnp.max(jnp.abs(out - ref))) / denom
    assert err < tol, f"normalized max error {err} >= {tol}"


# ---------------------------------------------------------------------------
if __name__ == "__main__":
    key = jax.random.PRNGKey(0)

    # ---- Case 1: the toy module config (gridless fused path) ----
    # input_size=32, output_size=8, nb_layers=3, max_nb_nodes=10, node_decay=1.5
    # -> layer sizes (32 -> 10) -> (10 -> 6) -> (6 -> 8), padded to F=128.
    input_size, output_size = 32, 8
    nb_layers, max_nb_nodes, node_decay = 3, 10, 1.5
    batch = 4

    key, kx, kp = jax.random.split(key, 3)
    x = jax.random.normal(kx, (batch, input_size), dtype=jnp.float32)
    params = init_params(kp, input_size, output_size, nb_layers,
                         max_nb_nodes, node_decay)
    w_stack, b_stack = pack_params(params)

    fwd = jax.jit(functools.partial(fused_mlp, out_features=output_size))
    out = jax.block_until_ready(fwd(x, w_stack, b_stack))
    ref = mlp_reference(x, params)
    assert out.shape == (batch, output_size)
    _check(out, ref, tol=2e-2)   # bf16 weights -> relaxed tolerance

    # ---- Case 2: larger config exercising the layer-grid + batch-grid path ----
    input_size2, output_size2 = 64, 32
    nb_layers2, max_nb_nodes2, node_decay2 = 6, 300, 1.3
    batch2 = 256

    key, kx2, kp2 = jax.random.split(key, 3)
    x2 = jax.random.normal(kx2, (batch2, input_size2), dtype=jnp.float32)
    params2 = init_params(kp2, input_size2, output_size2, nb_layers2,
                          max_nb_nodes2, node_decay2)
    w_stack2, b_stack2 = pack_params(params2)

    fwd2 = jax.jit(functools.partial(fused_mlp, out_features=output_size2))
    out2 = jax.block_until_ready(fwd2(x2, w_stack2, b_stack2))
    ref2 = mlp_reference(x2, params2)
    assert out2.shape == (batch2, output_size2)
    _check(out2, ref2, tol=1e-1)  # 6 bf16 layers -> looser quantization budget

    print("KERNEL_OK")
</pallas_src>

<mosaic_0001>
module attributes {stable_mosaic.version = 11 : i64} {
  func.func @_fused_mlp_kernel(%arg0: memref<8x128xf32, #tpu.memory_space<vmem>>, %arg1: memref<3x128x128xbf16, #tpu.memory_space<vmem>>, %arg2: memref<3x1x128xf32, #tpu.memory_space<vmem>>, %arg3: memref<8x128xf32, #tpu.memory_space<vmem>>) attributes {dimension_semantics = [], scalar_prefetch = 0 : i64, scratch_operands = 0 : i64, tpu.core_type = #tpu.core_type<tc>} {
    %c0 = arith.constant 0 : index
    %c0_0 = arith.constant 0 : index
    %0 = vector.load %arg0[%c0, %c0_0] : memref<8x128xf32, #tpu.memory_space<vmem>>, vector<8x128xf32>
    %1 = arith.truncf %0 : vector<8x128xf32> to vector<8x128xbf16>
    %c0_1 = arith.constant 0 : index
    %c0_2 = arith.constant 0 : index
    %c0_3 = arith.constant 0 : index
    %2 = vector.load %arg1[%c0_1, %c0_2, %c0_3] : memref<3x128x128xbf16, #tpu.memory_space<vmem>>, vector<1x128x128xbf16>
    %3 = vector.shape_cast %2 : vector<1x128x128xbf16> to vector<128x128xbf16>
    %cst = arith.constant dense<0.000000e+00> : vector<8x128xf32>
    %4 = tpu.matmul %1, %3, %cst {dimension_numbers = #tpu.dot_dimension_numbers<[1], [0], [0], [1], [0, 0, 1, 1], [], []>} : vector<8x128xbf16>, vector<128x128xbf16>, vector<8x128xf32> -> vector<8x128xf32>
    %c0_4 = arith.constant 0 : index
    %c0_5 = arith.constant 0 : index
    %c0_6 = arith.constant 0 : index
    %5 = vector.load %arg2[%c0_4, %c0_5, %c0_6] : memref<3x1x128xf32, #tpu.memory_space<vmem>>, vector<1x1x128xf32>
    %6 = vector.shape_cast %5 : vector<1x1x128xf32> to vector<1x128xf32>
    %7 = vector.broadcast %6 : vector<1x128xf32> to vector<8x128xf32>
    %8 = arith.addf %4, %7 : vector<8x128xf32>
    %cst_7 = arith.constant 0.00999999977 : f32
    %9 = vector.broadcast %cst_7 : f32 to vector<8x128xf32>
    %10 = arith.mulf %9, %8 : vector<8x128xf32>
    %11 = arith.maximumf %8, %10 : vector<8x128xf32>
    %12 = arith.truncf %11 : vector<8x128xf32> to vector<8x128xbf16>
    %c1 = arith.constant 1 : index
    %c0_8 = arith.constant 0 : index
    %c0_9 = arith.constant 0 : index
    %13 = vector.load %arg1[%c1, %c0_8, %c0_9] : memref<3x128x128xbf16, #tpu.memory_space<vmem>>, vector<1x128x128xbf16>
    %14 = vector.shape_cast %13 : vector<1x128x128xbf16> to vector<128x128xbf16>
    %cst_10 = arith.constant dense<0.000000e+00> : vector<8x128xf32>
    %15 = tpu.matmul %12, %14, %cst_10 {dimension_numbers = #tpu.dot_dimension_numbers<[1], [0], [0], [1], [0, 0, 1, 1], [], []>} : vector<8x128xbf16>, vector<128x128xbf16>, vector<8x128xf32> -> vector<8x128xf32>
    %c1_11 = arith.constant 1 : index
    %c0_12 = arith.constant 0 : index
    %c0_13 = arith.constant 0 : index
    %16 = vector.load %arg2[%c1_11, %c0_12, %c0_13] : memref<3x1x128xf32, #tpu.memory_space<vmem>>, vector<1x1x128xf32>
    %17 = vector.shape_cast %16 : vector<1x1x128xf32> to vector<1x128xf32>
    %18 = vector.broadcast %17 : vector<1x128xf32> to vector<8x128xf32>
    %19 = arith.addf %15, %18 : vector<8x128xf32>
    %cst_14 = arith.constant 0.00999999977 : f32
    %20 = vector.broadcast %cst_14 : f32 to vector<8x128xf32>
    %21 = arith.mulf %20, %19 : vector<8x128xf32>
    %22 = arith.maximumf %19, %21 : vector<8x128xf32>
    %23 = arith.truncf %22 : vector<8x128xf32> to vector<8x128xbf16>
    %c2 = arith.constant 2 : index
    %c0_15 = arith.constant 0 : index
    %c0_16 = arith.constant 0 : index
    %24 = vector.load %arg1[%c2, %c0_15, %c0_16] : memref<3x128x128xbf16, #tpu.memory_space<vmem>>, vector<1x128x128xbf16>
    %25 = vector.shape_cast %24 : vector<1x128x128xbf16> to vector<128x128xbf16>
    %cst_17 = arith.constant dense<0.000000e+00> : vector<8x128xf32>
    %26 = tpu.matmul %23, %25, %cst_17 {dimension_numbers = #tpu.dot_dimension_numbers<[1], [0], [0], [1], [0, 0, 1, 1], [], []>} : vector<8x128xbf16>, vector<128x128xbf16>, vector<8x128xf32> -> vector<8x128xf32>
    %c2_18 = arith.constant 2 : index
    %c0_19 = arith.constant 0 : index
    %c0_20 = arith.constant 0 : index
    %27 = vector.load %arg2[%c2_18, %c0_19, %c0_20] : memref<3x1x128xf32, #tpu.memory_space<vmem>>, vector<1x1x128xf32>
    %28 = vector.shape_cast %27 : vector<1x1x128xf32> to vector<1x128xf32>
    %29 = vector.broadcast %28 : vector<1x128xf32> to vector<8x128xf32>
    %30 = arith.addf %26, %29 : vector<8x128xf32>
    %cst_21 = arith.constant 0.00999999977 : f32
    %31 = vector.broadcast %cst_21 : f32 to vector<8x128xf32>
    %32 = arith.mulf %31, %30 : vector<8x128xf32>
    %33 = arith.maximumf %30, %32 : vector<8x128xf32>
    %c0_22 = arith.constant 0 : index
    %c0_23 = arith.constant 0 : index
    %34 = vector.load %arg3[%c0_22, %c0_23] : memref<8x128xf32, #tpu.memory_space<vmem>>, vector<8x128xf32>
    tpu.vector_store %arg3[%c0_22, %c0_23], %33 {strides = array<i32>} : memref<8x128xf32, #tpu.memory_space<vmem>>, vector<8x128xf32>,
    return
  }
}

</mosaic_0001>

<bundles_post_ra>
// kernel: fused_mlp.1
= control target key start
LH: loop header
LB: loop body
LE: loop exit
PB: predicated region body
PF: predicated region fallthrough
CT: control target
= control target key end

     0   :  { %8 = vsyncpa [#allocation3], 0  ;;  %s551_s12 = smov [#allocation2]   ;;  %s633_s0 = inlined_call_operand.vmem [shape: f32[8,128], index: 0, kind: input, shape index: {}]   ;;  %s634_s1 = inlined_call_operand.hbm [shape: bf16[3,128,128], index: 1, kind: input, shape index: {}]   ;;  %s635_s2 = inlined_call_operand.vmem [shape: f32[3,1,128], index: 2, kind: input, shape index: {}]   ;;  %s636_s3 = inlined_call_operand.vmem [shape: f32[8,128], index: 3, kind: output, shape index: {}]  }
   0x1   :  { %s16_s13 = sshll.u32 %s551_s12, 4  ;;  %s527_s16 = scalar_lea.hbm %s634_s1, 3072  ;;  %s17_s13 = int_to_ptr.vmem [resolvable:$true] %s16_s13 }
   0x2   :  { %p528_p0 = scmp.ne.s32.totalorder %s634_s1, %s527_s16  ;;  %p531_p1 = scmp.lt.u32.totalorder %s527_s16, %s634_s1 }
   0x4   :  { %p533_p2 = pnand %p531_p1, %p528_p0 }
   0x6   :  { %536 = shalt.err (!%p533_p2)
}
   0x7   :  { %s537_s21 = scalar_lea.vmem %s17_s13, 3072  ;;  %p542_p4 = scmp.lt.s32.totalorder %s17_s13, %s17_s13 }
   0x8   :  { %p538_p3 = scmp.ne.s32.totalorder %s17_s13, %s537_s21  ;;  %p543_p5 = scmp.lt.s32.totalorder %s537_s21, %s537_s21 }
   0xa   :  { %p544_p6 = por %p543_p5, %p542_p4 }
   0xc   :  { %p545_p7 = pnand %p544_p6, %p538_p3 }
   0xe   :  { %548 = shalt.err (!%p545_p7)
}
   0xf   :  { %s552_s22 = smov 64   ;;  %s553_s23 = smov 4  }
  0x10   :  { %22 = dma.hbm_to_vmem [thread:$0]  %s634_s1, 3072, %s17_s13, [#allocation3], %s552_s22, %s552_s22, %s553_s23  }
  0x11   :  { %549 = dma.done.wait [#allocation3], 3072  }
  0x12   :  { %550 = vsyncadd [#allocation3], 4294964224  ;;  %v554_v0 = vmov 0.0   ;;  %vm555_vm0 = vmmov 0   ;;  %v503_v1 = vld [vmem:[#allocation2] sm:$0xff]   ;;  %v504_v2 = vld [vmem:[#allocation2 + $0x8] sm:$0xff]  }
  0x13   :  { %438 = vmatprep.subr.bf16.mxu0 %v554_v0  ;;  %454 = vmatprep.mubr.msk.bf16.mxu0 %vm555_vm0, %v554_v0  ;;  %v505_v3 = vld [vmem:[#allocation2 + $0x10] sm:$0xff]   ;;  %v511_v4 = vld [vmem:[#allocation2 + $0x40] sm:$0xff]   ;;  %v506_v5 = vld [vmem:[#allocation2 + $0x18] sm:$0xff]  }
  0x14   :  { %458 = vmatprep.subr.bf16.mxu1 %v554_v0  ;;  %474 = vmatprep.mubr.msk.bf16.mxu1 %vm555_vm0, %v554_v0  ;;  %v512_v6 = vld [vmem:[#allocation2 + $0x48] sm:$0xff]   ;;  %v507_v7 = vld [vmem:[#allocation2 + $0x20] sm:$0xff]   ;;  %v513_v8 = vld [vmem:[#allocation2 + $0x50] sm:$0xff]  }
  0x15   :  { %439 = vmatpush3.bf16.msra.mxu0 %v503_v1  ;;  %459 = vmatpush3.bf16.msra.mxu1 %v511_v4  ;;  %v508_v9 = vld [vmem:[#allocation2 + $0x28] sm:$0xff]   ;;  %v514_v10 = vld [vmem:[#allocation2 + $0x58] sm:$0xff]   ;;  %v509_v11 = vld [vmem:[#allocation2 + $0x30] sm:$0xff]  }
  0x16   :  { %440 = vmatprep.subr.bf16.mxu0 %v554_v0  ;;  %460 = vmatprep.subr.bf16.mxu1 %v554_v0  ;;  %v515_v12 = vld [vmem:[#allocation2 + $0x60] sm:$0xff]   ;;  %v510_v13 = vld [vmem:[#allocation2 + $0x38] sm:$0xff]   ;;  %v516_v15 = vld [vmem:[#allocation2 + $0x68] sm:$0xff]  }
  0x17   :  { %v29_v14 = vld [vmem:[%s633_s0] sm:$0xff]  ;;  %v517_v17 = vld [vmem:[#allocation2 + $0x70] sm:$0xff]   ;;  %v518_v18 = vld [vmem:[#allocation2 + $0x78] sm:$0xff]  }
  0x18   :  { %v30_v16 = vpack.c.bf16 %v29_v14, %v29_v14  ;;  %v519_v19 = vld [vmem:[#allocation2 + $0x80] sm:$0xff]   ;;  %v520_v20 = vld [vmem:[#allocation2 + $0x88] sm:$0xff]   ;;  %v521_v21 = vld [vmem:[#allocation2 + $0x90] sm:$0xff]  }
  0x19   :  { %441 = vmatpush3.bf16.msra.mxu0 %v504_v2  ;;  %461 = vmatpush3.bf16.msra.mxu1 %v512_v6  ;;  %v522_v22 = vld [vmem:[#allocation2 + $0x98] sm:$0xff]   ;;  %v523_v23 = vld [vmem:[#allocation2 + $0xa0] sm:$0xff]   ;;  %v524_v24 = vld [vmem:[#allocation2 + $0xa8] sm:$0xff]  }
  0x1a   :  { %442 = vmatprep.subr.bf16.mxu0 %v554_v0  ;;  %462 = vmatprep.subr.bf16.mxu1 %v554_v0  ;;  %v382_v25 = vld [vmem:[%s635_s2] ss:$0 sm:$0xff]  ;;  %v525_v34 = vld [vmem:[#allocation2 + $0xb0] sm:$0xff]   ;;  %v526_v35 = vld [vmem:[#allocation2 + $0xb8] sm:$0xff]  }
  0x1b   :  { %v392_v36 = vld [vmem:[%s635_s2 + $0x1] ss:$0 sm:$0xff]  ;;  %v402_v45 = vld [vmem:[%s635_s2 + $0x2] ss:$0 sm:$0xff] }
  0x1d   :  { %443 = vmatpush3.bf16.msra.mxu0 %v505_v3  ;;  %463 = vmatpush3.bf16.msra.mxu1 %v513_v8 }
  0x1e   :  { %444 = vmatprep.subr.bf16.mxu0 %v554_v0  ;;  %464 = vmatprep.subr.bf16.mxu1 %v554_v0 }
  0x21   :  { %445 = vmatpush3.bf16.msra.mxu0 %v506_v5  ;;  %465 = vmatpush3.bf16.msra.mxu1 %v514_v10 }
  0x22   :  { %446 = vmatprep.subr.bf16.mxu0 %v554_v0  ;;  %466 = vmatprep.subr.bf16.mxu1 %v554_v0 }
  0x25   :  { %447 = vmatpush3.bf16.msra.mxu0 %v507_v7  ;;  %467 = vmatpush3.bf16.msra.mxu1 %v515_v12 }
  0x26   :  { %448 = vmatprep.subr.bf16.mxu0 %v554_v0  ;;  %468 = vmatprep.subr.bf16.mxu1 %v554_v0 }
  0x29   :  { %449 = vmatpush3.bf16.msra.mxu0 %v508_v9  ;;  %469 = vmatpush3.bf16.msra.mxu1 %v516_v15 }
  0x2a   :  { %450 = vmatprep.subr.bf16.mxu0 %v554_v0  ;;  %470 = vmatprep.subr.bf16.mxu1 %v554_v0 }
  0x2d   :  { %451 = vmatpush3.bf16.msra.mxu0 %v509_v11  ;;  %471 = vmatpush3.bf16.msra.mxu1 %v517_v17 }
  0x2e   :  { %452 = vmatprep.subr.bf16.mxu0 %v554_v0  ;;  %472 = vmatprep.subr.bf16.mxu1 %v554_v0 }
  0x31   :  { %453 = vmatpush3.bf16.msra.mxu0 %v510_v13  ;;  %473 = vmatpush3.bf16.msra.mxu1 %v518_v18 }
  0x32   :  { %478 = vmatprep.subr.bf16.mxu0 %v554_v0 }
  0x34   :  { %455 = vmatmul.mubr.bf16.vlgmr.msra.gmra.mrb[0].mxu0 %v30_v16 }
  0x35   :  { %494 = vmatprep.mubr.msk.bf16.mxu0 %vm555_vm0, %v554_v0  ;;  %479 = vmatpush3.bf16.msra.mxu0 %v519_v19 }
  0x36   :  { %480 = vmatprep.subr.bf16.mxu0 %v554_v0 }
  0x39   :  { %481 = vmatpush3.bf16.msra.mxu0 %v520_v20 }
  0x3a   :  { %482 = vmatprep.subr.bf16.mxu0 %v554_v0 }
  0x3d   :  { %483 = vmatpush3.bf16.msra.mxu0 %v521_v21 }
  0x3e   :  { %484 = vmatprep.subr.bf16.mxu0 %v554_v0 }
  0x41   :  { %485 = vmatpush3.bf16.msra.mxu0 %v522_v22 }
  0x42   :  { %486 = vmatprep.subr.bf16.mxu0 %v554_v0 }
  0x45   :  { %487 = vmatpush3.bf16.msra.mxu0 %v523_v23 }
  0x46   :  { %488 = vmatprep.subr.bf16.mxu0 %v554_v0 }
  0x49   :  { %489 = vmatpush3.bf16.msra.mxu0 %v524_v24 }
  0x4a   :  { %490 = vmatprep.subr.bf16.mxu0 %v554_v0 }
  0x4d   :  { %491 = vmatpush3.bf16.msra.mxu0 %v525_v34 }
  0x4e   :  { %492 = vmatprep.subr.bf16.mxu0 %v554_v0 }
  0x51   :  { %493 = vmatpush3.bf16.msra.mxu0 %v526_v35 }
 0x107   :  { %v136_v26 = vpop.f32.mrb[0].mxu0 }
 0x108   :  { %v137_v27 = vadd.f32 %v382_v25, %v136_v26  ;;  %v456_v28 = vpop.f32.mrb[1].mxu0 }
 0x109   :  { %v139_v29 = vpop.f32.mrb[2].mxu0 }
 0x10a   :  { %v142_v30 = vmul.f32 0.01, %v137_v27  ;;  %v457_v31 = vpop.f32.mrb[3].mxu0 }
 0x10c   :  { %v143_v32 = vmax.f32 %v137_v27, %v142_v30 }
 0x10e   :  { %v144_v33 = vpack.c.bf16 %v143_v32, %v143_v32 }
 0x110   :  { %475 = vmatmul.mubr.bf16.vlgmr.msra.gmra.mrb[0].mxu1 %v144_v33 }
 0x1e3   :  { %v252_v37 = vpop.f32.mrb[0].mxu1 }
 0x1e4   :  { %v253_v38 = vadd.f32 %v392_v36, %v252_v37  ;;  %v476_v39 = vpop.f32.mrb[1].mxu1 }
 0x1e5   :  { %v255_v40 = vpop.f32.mrb[2].mxu1 }
 0x1e6   :  { %v258_v41 = vmul.f32 0.01, %v253_v38  ;;  %v477_v42 = vpop.f32.mrb[3].mxu1 }
 0x1e8   :  { %v259_v43 = vmax.f32 %v253_v38, %v258_v41 }
 0x1ea   :  { %v260_v44 = vpack.c.bf16 %v259_v43, %v259_v43 }
 0x1ec   :  { %495 = vmatmul.mubr.bf16.vlgmr.msra.gmra.mrb[4].mxu0 %v260_v44 }
 0x2bf   :  { %v368_v46 = vpop.f32.mrb[4].mxu0 }
 0x2c0   :  { %v369_v47 = vadd.f32 %v402_v45, %v368_v46  ;;  %v496_v48 = vpop.f32.mrb[5].mxu0 }
 0x2c1   :  { %v371_v49 = vpop.f32.mrb[6].mxu0 }
 0x2c2   :  { %v374_v50 = vmul.f32 0.01, %v369_v47  ;;  %v497_v51 = vpop.f32.mrb[7].mxu0 }
 0x2c4   :  { %v375_v52 = vmax.f32 %v369_v47, %v374_v50 }
 0x2c6   :  { %376 = vst [vmem:[%s636_s3] sm:$0xff] %v375_v52 }
 0x2c7   :  { %381 = vsyncpa [#allocation3], 1 }

</bundles_post_ra>
